<compile_context>
chip_gen: v6e
topology: v6e:2x2x1
jax: 0.10.0
libtpu: 0.0.40
codegen_flags: <defaults>
</compile_context>

<pallas_src>
import functools

import jax
import jax.numpy as jnp
from jax import lax
from jax.experimental import pallas as pl
from jax.experimental.pallas import tpu as pltpu


def _vector_transform_kernel(tune_ref, disp_ref, scale_ref, x_ref, o_ref, *,
                             num_steps: int, chunk_rows: int):
    """One (tile_rows, lane) tile, processed in register-resident row chunks:

         dt = (x + tune) * (1/num_steps)
         y  = init_displacement ; v = dt
         repeat num_steps times:  (y, v) <- (y + v, v - y * dt)   # old y on RHS
         out = y * scaling_factor
    """
    tune = tune_ref[0]
    disp = disp_ref[0]
    scale = scale_ref[0]
    inv_steps = 1.0 / float(num_steps)          # trace-time constant: mul, not divide

    n_chunks = x_ref.shape[0] // chunk_rows     # wrapper guarantees exact division

    @pl.loop(0, n_chunks)
    def _(c):
        r = pl.multiple_of(c * chunk_rows, chunk_rows)
        # Single VMEM load per chunk; everything below lives in vregs.
        x = x_ref[pl.ds(r, chunk_rows), :].astype(jnp.float32)
        dt = (x + tune) * inv_steps
        y = jnp.full_like(x, disp)
        v = dt

        def step(_, carry):
            y, v = carry
            # RHS uses the *old* y (PyTorch tuple-assignment semantics).
            return (y + v, v - y * dt)

        y, _ = lax.fori_loop(0, num_steps, step, (y, v), unroll=True)
        # Single VMEM store per chunk.
        o_ref[pl.ds(r, chunk_rows), :] = (y * scale).astype(o_ref.dtype)


def custom_layer_forward(x, tune, init_displacement, scaling_factor,
                         num_steps: int = 19,
                         max_tile_rows: int = 1024,
                         max_chunk_rows: int = 16):
    """JAX/Pallas equivalent of CustomLayer.forward (vector_transform)."""
    B, N, C = x.shape
    total = x.size

    # ---- lane-dense 2-D view; avoid any pad/copy whenever possible ---------
    lane = next((l for l in (512, 256, 128) if total % l == 0), 128)
    n_rows = pl.cdiv(total, lane)
    padded_total = n_rows * lane

    flat = x.reshape(-1)
    if padded_total != total:                   # rare: at most lane-1 pad elements
        flat = jnp.pad(flat, (0, padded_total - total))
    x2d = flat.reshape(n_rows, lane)

    # ---- tile rows: multiple of 8, capped, and >=2 blocks when possible ----
    if n_rows <= 16:
        tile_rows = n_rows                      # single tiny block (full-dim block ok)
    else:
        half = -(-((n_rows + 1) // 2) // 8) * 8     # ~half the rows, rounded up to 8
        tile_rows = min(max_tile_rows, half)
    n_blocks = pl.cdiv(n_rows, tile_rows)

    # ---- register-resident chunk size (must divide tile_rows) --------------
    if tile_rows >= max_chunk_rows and tile_rows % max_chunk_rows == 0:
        chunk_rows = max_chunk_rows
    elif tile_rows % 8 == 0:
        chunk_rows = 8
    else:
        chunk_rows = tile_rows

    tune_a = jnp.asarray(tune, jnp.float32).reshape(1)
    disp_a = jnp.asarray(init_displacement, jnp.float32).reshape(1)
    scale_a = jnp.asarray(scaling_factor, jnp.float32).reshape(1)

    kernel = functools.partial(_vector_transform_kernel,
                               num_steps=num_steps, chunk_rows=chunk_rows)

    out2d = pl.pallas_call(
        kernel,
        out_shape=jax.ShapeDtypeStruct((n_rows, lane), x.dtype),
        grid=(n_blocks,),
        in_specs=[
            pl.BlockSpec(memory_space=pltpu.MemorySpace.SMEM),   # tune
            pl.BlockSpec(memory_space=pltpu.MemorySpace.SMEM),   # init_displacement
            pl.BlockSpec(memory_space=pltpu.MemorySpace.SMEM),   # scaling_factor
            pl.BlockSpec((tile_rows, lane), lambda i: (i, 0)),   # x tile
        ],
        out_specs=pl.BlockSpec((tile_rows, lane), lambda i: (i, 0)),
        compiler_params=pltpu.CompilerParams(
            dimension_semantics=("parallel",),   # lets v7x shard across both TCs
        ),
    )(tune_a, disp_a, scale_a, x2d)

    # No extra HBM round trip in the common (no-padding) case.
    out_flat = out2d.reshape(-1)
    if padded_total != total:
        out_flat = out_flat[:total]
    return out_flat.reshape(B, -1, C)


def _reference(x, tune, disp, scale, num_steps=19):
    dt = (x + tune) / num_steps
    y = jnp.zeros_like(x) + disp
    v = dt
    for _ in range(num_steps):
        y, v = (y + v, v - y * dt)
    return y * scale


if __name__ == "__main__":
    key = jax.random.PRNGKey(0)
    B, N, C = 4, 512, 8   # small (batch, seq, channels) shape consistent with the module
    x = jax.random.uniform(key, (B, N, C), dtype=jnp.float32)

    # Deterministic parameter values matching the module's __init__.
    tune = jnp.float32(3.0)
    init_displacement = jnp.float32(0.0)
    scaling_factor = jnp.float32(1.0)

    out = custom_layer_forward(x, tune, init_displacement, scaling_factor)
    out = jax.block_until_ready(out)

    ref = _reference(x, 3.0, 0.0, 1.0)
    assert out.shape == (B, N, C)
    assert jnp.allclose(out, ref, atol=1e-5, rtol=1e-5), "mismatch vs reference"

    print("KERNEL_OK")
</pallas_src>

<mosaic_0001>
module attributes {stable_mosaic.version = 11 : i64} {
  func.func @_vector_transform_kernel(%arg0: i32, %arg1: memref<1xf32, #tpu.memory_space<smem>>, %arg2: memref<1xf32, #tpu.memory_space<smem>>, %arg3: memref<1xf32, #tpu.memory_space<smem>>, %arg4: memref<16x512xf32, #tpu.memory_space<vmem>>, %arg5: memref<16x512xf32, #tpu.memory_space<vmem>>) attributes {dimension_semantics = [#tpu.dimension_semantics<parallel>], iteration_bounds = array<i64: 2>, scalar_prefetch = 0 : i64, scratch_operands = 0 : i64, tpu.core_type = #tpu.core_type<tc>, window_params = [{transform_indices = @transform_0, window_bounds = array<i64: 1>}, {transform_indices = @transform_1, window_bounds = array<i64: 1>}, {transform_indices = @transform_2, window_bounds = array<i64: 1>}, {transform_indices = @transform_3, window_bounds = array<i64: 16, 512>}, {transform_indices = @transform_4, window_bounds = array<i64: 16, 512>}]} {
    %c0 = arith.constant 0 : index
    %0 = memref.load %arg1[%c0] : memref<1xf32, #tpu.memory_space<smem>>
    %c0_0 = arith.constant 0 : index
    %1 = memref.load %arg2[%c0_0] : memref<1xf32, #tpu.memory_space<smem>>
    %c0_1 = arith.constant 0 : index
    %2 = memref.load %arg3[%c0_1] : memref<1xf32, #tpu.memory_space<smem>>
    %c0_i32 = arith.constant 0 : i32
    %c1_i32 = arith.constant 1 : i32
    %3 = arith.muli %c0_i32, %c1_i32 : i32
    %c0_i32_2 = arith.constant 0 : i32
    %4 = arith.addi %c0_i32_2, %3 : i32
    %c16_i32 = arith.constant 16 : i32
    %5 = arith.muli %4, %c16_i32 : i32
    %6 = tpu.assume_multiple %5, 16 : i32
    %7 = arith.index_cast %6 : i32 to index
    %c0_3 = arith.constant 0 : index
    %8 = vector.load %arg4[%7, %c0_3] : memref<16x512xf32, #tpu.memory_space<vmem>>, vector<16x512xf32>
    %9 = vector.broadcast %0 : f32 to vector<16x512xf32>
    %10 = arith.addf %8, %9 : vector<16x512xf32>
    %cst = arith.constant 0.0526315793 : f32
    %11 = vector.broadcast %cst : f32 to vector<16x512xf32>
    %12 = arith.mulf %10, %11 : vector<16x512xf32>
    %13 = vector.broadcast %1 : f32 to vector<16x512xf32>
    %c0_i32_4 = arith.constant 0 : i32
    %14 = arith.addf %13, %12 : vector<16x512xf32>
    %15 = arith.mulf %13, %12 : vector<16x512xf32>
    %16 = arith.subf %12, %15 : vector<16x512xf32>
    %c1_i32_5 = arith.constant 1 : i32
    %17 = arith.addf %14, %16 : vector<16x512xf32>
    %18 = arith.mulf %14, %12 : vector<16x512xf32>
    %19 = arith.subf %16, %18 : vector<16x512xf32>
    %c2_i32 = arith.constant 2 : i32
    %20 = arith.addf %17, %19 : vector<16x512xf32>
    %21 = arith.mulf %17, %12 : vector<16x512xf32>
    %22 = arith.subf %19, %21 : vector<16x512xf32>
    %c3_i32 = arith.constant 3 : i32
    %23 = arith.addf %20, %22 : vector<16x512xf32>
    %24 = arith.mulf %20, %12 : vector<16x512xf32>
    %25 = arith.subf %22, %24 : vector<16x512xf32>
    %c4_i32 = arith.constant 4 : i32
    %26 = arith.addf %23, %25 : vector<16x512xf32>
    %27 = arith.mulf %23, %12 : vector<16x512xf32>
    %28 = arith.subf %25, %27 : vector<16x512xf32>
    %c5_i32 = arith.constant 5 : i32
    %29 = arith.addf %26, %28 : vector<16x512xf32>
    %30 = arith.mulf %26, %12 : vector<16x512xf32>
    %31 = arith.subf %28, %30 : vector<16x512xf32>
    %c6_i32 = arith.constant 6 : i32
    %32 = arith.addf %29, %31 : vector<16x512xf32>
    %33 = arith.mulf %29, %12 : vector<16x512xf32>
    %34 = arith.subf %31, %33 : vector<16x512xf32>
    %c7_i32 = arith.constant 7 : i32
    %35 = arith.addf %32, %34 : vector<16x512xf32>
    %36 = arith.mulf %32, %12 : vector<16x512xf32>
    %37 = arith.subf %34, %36 : vector<16x512xf32>
    %c8_i32 = arith.constant 8 : i32
    %38 = arith.addf %35, %37 : vector<16x512xf32>
    %39 = arith.mulf %35, %12 : vector<16x512xf32>
    %40 = arith.subf %37, %39 : vector<16x512xf32>
    %c9_i32 = arith.constant 9 : i32
    %41 = arith.addf %38, %40 : vector<16x512xf32>
    %42 = arith.mulf %38, %12 : vector<16x512xf32>
    %43 = arith.subf %40, %42 : vector<16x512xf32>
    %c10_i32 = arith.constant 10 : i32
    %44 = arith.addf %41, %43 : vector<16x512xf32>
    %45 = arith.mulf %41, %12 : vector<16x512xf32>
    %46 = arith.subf %43, %45 : vector<16x512xf32>
    %c11_i32 = arith.constant 11 : i32
    %47 = arith.addf %44, %46 : vector<16x512xf32>
    %48 = arith.mulf %44, %12 : vector<16x512xf32>
    %49 = arith.subf %46, %48 : vector<16x512xf32>
    %c12_i32 = arith.constant 12 : i32
    %50 = arith.addf %47, %49 : vector<16x512xf32>
    %51 = arith.mulf %47, %12 : vector<16x512xf32>
    %52 = arith.subf %49, %51 : vector<16x512xf32>
    %c13_i32 = arith.constant 13 : i32
    %53 = arith.addf %50, %52 : vector<16x512xf32>
    %54 = arith.mulf %50, %12 : vector<16x512xf32>
    %55 = arith.subf %52, %54 : vector<16x512xf32>
    %c14_i32 = arith.constant 14 : i32
    %56 = arith.addf %53, %55 : vector<16x512xf32>
    %57 = arith.mulf %53, %12 : vector<16x512xf32>
    %58 = arith.subf %55, %57 : vector<16x512xf32>
    %c15_i32 = arith.constant 15 : i32
    %59 = arith.addf %56, %58 : vector<16x512xf32>
    %60 = arith.mulf %56, %12 : vector<16x512xf32>
    %61 = arith.subf %58, %60 : vector<16x512xf32>
    %c16_i32_6 = arith.constant 16 : i32
    %62 = arith.addf %59, %61 : vector<16x512xf32>
    %63 = arith.mulf %59, %12 : vector<16x512xf32>
    %64 = arith.subf %61, %63 : vector<16x512xf32>
    %c17_i32 = arith.constant 17 : i32
    %65 = arith.addf %62, %64 : vector<16x512xf32>
    %66 = arith.mulf %62, %12 : vector<16x512xf32>
    %67 = arith.subf %64, %66 : vector<16x512xf32>
    %c18_i32 = arith.constant 18 : i32
    %68 = arith.addf %65, %67 : vector<16x512xf32>
    %69 = arith.mulf %65, %12 : vector<16x512xf32>
    %70 = arith.subf %67, %69 : vector<16x512xf32>
    %71 = vector.broadcast %2 : f32 to vector<16x512xf32>
    %72 = arith.mulf %68, %71 : vector<16x512xf32>
    %73 = arith.index_cast %6 : i32 to index
    %c0_7 = arith.constant 0 : index
    %74 = vector.load %arg5[%73, %c0_7] : memref<16x512xf32, #tpu.memory_space<vmem>>, vector<16x512xf32>
    tpu.vector_store %arg5[%73, %c0_7], %72 {strides = array<i32>} : memref<16x512xf32, #tpu.memory_space<vmem>>, vector<16x512xf32>,
    %c1_i32_8 = arith.constant 1 : i32
    return
  }
  func.func @transform_0(%arg0: i32) -> i32 {
    %c0_i32 = arith.constant 0 : i32
    %c0_i32_0 = arith.constant 0 : i32
    return %c0_i32 : i32
  }
  func.func @transform_1(%arg0: i32) -> i32 {
    %c0_i32 = arith.constant 0 : i32
    %c0_i32_0 = arith.constant 0 : i32
    return %c0_i32 : i32
  }
  func.func @transform_2(%arg0: i32) -> i32 {
    %c0_i32 = arith.constant 0 : i32
    %c0_i32_0 = arith.constant 0 : i32
    return %c0_i32 : i32
  }
  func.func @transform_3(%arg0: i32) -> (i32, i32) {
    %c0_i32 = arith.constant 0 : i32
    %c0_i32_0 = arith.constant 0 : i32
    return %arg0, %c0_i32 : i32, i32
  }
  func.func @transform_4(%arg0: i32) -> (i32, i32) {
    %c0_i32 = arith.constant 0 : i32
    %c0_i32_0 = arith.constant 0 : i32
    return %arg0, %c0_i32 : i32, i32
  }
}

</mosaic_0001>

<bundles_post_ra>
// kernel: tpu_custom_call.1
= control target key start
LH: loop header
LB: loop body
LE: loop exit
PB: predicated region body
PF: predicated region fallthrough
CT: control target
= control target key end

     0   :  { %s1382_s0 = inlined_call_operand.<no memory space> [shape: f32[1], index: 0, kind: input, shape index: {}]   ;;  %s1383_s1 = inlined_call_operand.<no memory space> [shape: f32[1], index: 1, kind: input, shape index: {}]   ;;  %s1384_s2 = inlined_call_operand.<no memory space> [shape: f32[1], index: 2, kind: input, shape index: {}]   ;;  %s1385_s3 = inlined_call_operand.hbm [shape: f32[32,512], index: 3, kind: input, shape index: {}]   ;;  %s1386_s4 = inlined_call_operand.hbm [shape: f32[32,512], index: 4, kind: output, shape index: {}]  }
   0x1   :  { %9 = sst [smem:[#allocation2]] %s1382_s0 }
   0x2   :  { %10 = sst [smem:[#allocation3]] %s1383_s1 }
   0x3   :  { %11 = sst [smem:[#allocation4]] %s1384_s2 }
   0x4   :  { %12 = vsyncpa [#allocation6], 0 }
   0x5   :  { %14 = vsyncpa [#allocation6 + $0x1], 0 }
   0x6   :  { %15 = vsyncpa [#allocation7], 0 }
   0x7   :  { %17 = vsyncpa [#allocation7 + $0x1], 0  ;;  %s1005_s21 = smov 0   ;;  %s1007_s22 = smov 0  }
   0x8   :  { %s1009_s23 = smov 0   ;;  %s1011_s24 = smov 0  }
   0x9 LB: > { %s1026_s0 = sadd.s32 4294967295, %s963_s24   ;;  %s801_s1 = sadd.s32 4294967294, %s963_s24   ;;  %s963_s24 = sphi %s1011_s24, %s1401_s24   ;;  %s959_s23 = sphi %s1009_s23, %s1400_s23   ;;  %s955_s22 = sphi %s1007_s22, %s1399_s22   ;;  %s951_s21 = sphi %s1005_s21, %s1398_s21  }
   0xa   : > { %s1030_s2 = sadd.s32 1, %s963_s24   ;;  %s93_s25 = sadd.s32 1, %s959_s23 }
   0xb   : > { %s90_s26 = ssub.s32 %s963_s24, %s1030_s2  ;;  %p100_p0 = scmp.ne.s32.totalorder %s959_s23, %s955_s22 }
   0xc   : > { %p91_p1 = scmp.eq.s32.totalorder %s90_s26, 0  ;;  %p101_p2 = scmp.eq.s32.totalorder %s963_s24, 0 }
   0xd   : > { %p106_p3 = scmp.ne.s32.totalorder %s955_s22, %s951_s21  ;;  %p107_p4 = scmp.eq.s32.totalorder %s1026_s0, 0 }
   0xe   : > { %s1042_s27 = scalar_select %p91_p1, %s959_s23, %s93_s25  }
   0xf   : > { %p1044_p5 = por %p101_p2, %p100_p0  ;;  %p1048_p6 = por %p107_p4, %p106_p3 }
  0x10   : > { %p130_p7 = scmp.eq.s32.totalorder %s1026_s0, 1  ;;  %p136_p8 = scmp.eq.s32.totalorder %s801_s1, 1 }
  0x11   : > { %s1390_s29 = scalar_select %p1048_p6, 1, 0 }
  0x12   : > { %p833_p10 = scmp.lt.s32.totalorder %s963_s24, 2  ;;  %p1055_p11 = por %p130_p7, %p100_p0 }
  0x13   : > { %p1059_p12 = por %p136_p8, %p106_p3  ;;  %s165_s6 = sand.u32 1, %s959_s23  }
  0x14   : > { %s1391_s30 = scalar_select %p1055_p11, 1, 0 }
  0x15   : > { %s1392_s5 = scalar_select %p1059_p12, 1, 0 }
  0x16   : > { %s818_s7 = sshll.u32 %s963_s24, 10  ;;  %s804_s8 = sshll.u32 %s165_s6, 6 }
  0x17   : > { %s1068_s11 = scalar_lea.hbm %s1385_s3, %s818_s7  ;;  %s169_s12 = scalar_lea.vmem [#allocation5], %s804_s8 }
  0x18   : > { %s177_s13 = sshll.u32 %s169_s12, 4  ;;  %p1072_p13 = pnand %p833_p10, %p1044_p5  ;;  %s1076_s13 = int_to_ptr.vmem [resolvable:$true] %s177_s13 }
  0x19   : > { %s1078_s15 = scalar_lea.sflag [#allocation6], %s165_s6  ;;  %s871_s16 = scalar_lea.hbm %s1068_s11, 1024 }
  0x1a   : > { %p872_p0 = scmp.ne.s32.totalorder %s1068_s11, %s871_s16  ;;  %p873_p1 = pneg %p1072_p13 }
  0x1b   : > { %s876_s19 = scalar_lea.hbm %s1385_s3, 2048  ;;  %p877_p4 = scmp.lt.s32.totalorder %s1068_s11, %s1385_s3 }
  0x1c   : > { %p874_p2 = pnand %p873_p1, %p872_p0  ;;  %p878_p5 = scmp.lt.s32.totalorder %s876_s19, %s871_s16 }
  0x1e   : > { %p875_p3 = pneg %p874_p2  ;;  %p879_p7 = por %p878_p5, %p877_p4 }
  0x20   : > { %p880_p8 = pnand %p879_p7, %p875_p3 }
  0x22   : > { %883 = shalt.err (!%p880_p8)
}
  0x23   : > { %s884_s25 = scalar_lea.vmem %s1076_s13, 1024  ;;  %s965_s26 = smov [#allocation5]  }
  0x24   : > { %p885_p10 = scmp.ne.s32.totalorder %s1076_s13, %s884_s25  ;;  %s889_s28 = sshll.u32 %s965_s26, 4  ;;  %s890_s28 = int_to_ptr.vmem [resolvable:$false] %s889_s28 }
  0x25   : > { %s891_s6 = scalar_lea.vmem %s890_s28, 2048  ;;  %p892_p2 = scmp.lt.s32.totalorder %s1076_s13, %s890_s28 }
  0x26   : > { %p887_p9 = pnand %p885_p10, %p873_p1  ;;  %p893_p12 = scmp.lt.s32.totalorder %s891_s6, %s884_s25 }
  0x28   : > { %p888_p0 = pneg %p887_p9  ;;  %p894_p11 = por %p893_p12, %p892_p2 }
  0x2a   : > { %p895_p6 = pnand %p894_p11, %p888_p0 }
  0x2c   : > { %898 = shalt.err (!%p895_p6)
}
  0x2d   : > { %s966_s7 = smov 512   ;;  %s967_s8 = smov 32  }
  0x2e   : > { %828 = dma.hbm_to_vmem [thread:$0]  (!%p1072_p13), %s1068_s11, 1024, %s1076_s13, %s1078_s15, %s966_s7, %s966_s7, %s967_s8  }
  0x2f   : > { %p808_p9 = scmp.ge.s32.totalorder %s963_s24, 1  ;;  %p185_p1 = scmp.lt.s32.totalorder %s963_s24, 3 }
  0x31   : > { %p186_p3 = pnand %p808_p9, %p185_p1 }
  0x32   : > { %s1102_s9 = sand.u32 (!%p186_p3), 1, %s955_s22   ;;  %p1394_p6 = scmp.ne.s32.totalorder (!%p186_p3), %s1390_s29, 0 }
  0x33   : > { %189 = sbr.rel (%p186_p3) target bundleno = 201 (0xc9), region = 36  ;;  %s809_s10 = sshll.u32 (!%p186_p3), %s1102_s9, 6 }
  0x34   : > { %s192_s12 = scalar_lea.sflag (!%p186_p3), [#allocation6], %s1102_s9  ;;  %s195_s16 = scalar_lea.vmem (!%p186_p3), [#allocation5], %s809_s10 }
  0x38   : > { %942 = dma.done.wait (%p1394_p6), %s192_s12, 1024  }
  0x39   : > { %944 = vsyncadd (%p1394_p6), %s192_s12, 4294966272  ;;  %s222_s11 = sld [smem:[#allocation2]]  ;;  %v228_v0 = vld [vmem:[%s195_s16] sm:$0xff]  ;;  %v229_v1 = vld [vmem:[%s195_s16 + $0x8] sm:$0xff]  ;;  %s1243_s29 = scalar_lea.vmem [#allocation8], %s809_s10 }
  0x3a   : > { %s223_s13 = sld [smem:[#allocation3]]  ;;  %v230_v2 = vld [vmem:[%s195_s16 + $0x10] sm:$0xff]  ;;  %v231_v4 = vld [vmem:[%s195_s16 + $0x18] sm:$0xff]  ;;  %v232_v5 = vld [vmem:[%s195_s16 + $0x20] sm:$0xff]  ;;  %s728_s15 = sshll.u32 %s1243_s29, 4  ;;  %s1329_s15 = int_to_ptr.vmem [resolvable:$true] %s728_s15 }
  0x3b   : > { %s224_s14 = sld [smem:[#allocation4]]  ;;  %v233_v6 = vld [vmem:[%s195_s16 + $0x28] sm:$0xff]  ;;  %v234_v10 = vld [vmem:[%s195_s16 + $0x30] sm:$0xff]  ;;  %v235_v11 = vld [vmem:[%s195_s16 + $0x38] sm:$0xff]  ;;  %s820_s17 = sshll.u32 %s1026_s0, 10 }
  0x3c   : > { %s1337_s20 = scalar_lea.hbm %s1386_s4, %s820_s17  ;;  %s714_s1 = scalar_lea.sflag [#allocation7], %s1102_s9 }
  0x3d   : > { %s899_s0 = scalar_lea.vmem %s1329_s15, 1024  ;;  %p1395_p12 = scmp.ne.s32.totalorder %s1391_s30, 0 }
  0x3e   : > { %p900_p11 = scmp.ne.s32.totalorder %s1329_s15, %s899_s0  ;;  %s968_s25 = smov [#allocation8]  }
  0x3f   : > { %v236_v3 = vstv %s222_s11  ;;  %s903_s26 = sshll.u32 %s968_s25, 4  ;;  %s904_s26 = int_to_ptr.vmem [resolvable:$false] %s903_s26 }
  0x40   : > { %v237_v7 = vadd.f32 %v236_v3, %v228_v0  ;;  %v238_v8 = vadd.f32 %v236_v3, %v229_v1  ;;  %v239_v9 = vadd.f32 %v236_v3, %v230_v2  ;;  %v240_v12 = vadd.f32 %v236_v3, %v231_v4  ;;  %p901_p13 = pnand %p900_p11, %p1395_p12  ;;  %s905_s28 = scalar_lea.vmem %s904_s26, 2048 }
  0x41   : > { %v241_v13 = vadd.f32 %v236_v3, %v232_v5  ;;  %v242_v14 = vadd.f32 %v236_v3, %v233_v6  ;;  %v1112_v15 = vstv %s223_s13  ;;  %v243_v16 = vadd.f32 %v236_v3, %v234_v10  ;;  %p906_p5 = scmp.lt.s32.totalorder %s1329_s15, %s904_s26  ;;  %p907_p7 = scmp.lt.s32.totalorder %s905_s28, %s899_s0 }
  0x42   : > { %v244_v17 = vadd.f32 %v236_v3, %v235_v11  ;;  %v1114_v18 = vmul.f32 0.05263158, %v237_v7  ;;  %v1116_v19 = vmul.f32 0.05263158, %v238_v8  ;;  %v1118_v20 = vmul.f32 0.05263158, %v239_v9  ;;  %p902_p4 = pneg %p901_p13 }
  0x43   : > { %v1120_v21 = vmul.f32 0.05263158, %v240_v12  ;;  %v1122_v22 = vmul.f32 0.05263158, %v241_v13  ;;  %v1124_v23 = vstv %s224_s14  ;;  %v1126_v24 = vmul.f32 0.05263158, %v242_v14  ;;  %p908_p8 = por %p907_p7, %p906_p5 }
  0x44   : > { %v1128_v25 = vmul.f32 0.05263158, %v243_v16  ;;  %v1130_v26 = vmul.f32 0.05263158, %v244_v17  ;;  %v254_v27 = vadd.f32 %v1112_v15, %v1114_v18  ;;  %v262_v28 = vmul.f32 %v1112_v15, %v1114_v18 }
  0x45   : > { %v255_v29 = vadd.f32 %v1112_v15, %v1116_v19  ;;  %v263_v30 = vmul.f32 %v1112_v15, %v1116_v19  ;;  %v256_v31 = vadd.f32 %v1112_v15, %v1118_v20  ;;  %v264_v33 = vmul.f32 %v1112_v15, %v1118_v20  ;;  %p909_p10 = pnand %p908_p8, %p902_p4 }
  0x46   : > { %v286_v32 = vmul.f32 %v254_v27, %v1114_v18  ;;  %v257_v34 = vadd.f32 %v1112_v15, %v1120_v21  ;;  %v265_v35 = vmul.f32 %v1112_v15, %v1120_v21  ;;  %v270_v36 = vsub.f32 %v1114_v18, %v262_v28 }
  0x47   : > { %v271_v37 = vsub.f32 %v1116_v19, %v263_v30  ;;  %v287_v38 = vmul.f32 %v255_v29, %v1116_v19  ;;  %v288_v39 = vmul.f32 %v256_v31, %v1118_v20  ;;  %v272_v40 = vsub.f32 %v1118_v20, %v264_v33 }
  0x48   : > { %v273_v41 = vsub.f32 %v1120_v21, %v265_v35  ;;  %v289_v42 = vmul.f32 %v257_v34, %v1120_v21  ;;  %v1158_v43 = vadd.f32 %v1112_v15, %v1122_v22  ;;  %v278_v44 = vadd.f32 %v270_v36, %v254_v27 }
  0x49   : > { %v294_v45 = vsub.f32 %v270_v36, %v286_v32  ;;  %v279_v46 = vadd.f32 %v271_v37, %v255_v29  ;;  %v295_v47 = vsub.f32 %v271_v37, %v287_v38  ;;  %v280_v48 = vadd.f32 %v272_v40, %v256_v31 }
  0x4a   : > { %v296_v49 = vsub.f32 %v272_v40, %v288_v39  ;;  %v281_v50 = vadd.f32 %v273_v41, %v257_v34  ;;  %v297_v51 = vsub.f32 %v273_v41, %v289_v42  ;;  %v310_v53 = vmul.f32 %v278_v44, %v1114_v18 }
  0x4b   : > { %v302_v52 = vadd.f32 %v294_v45, %v278_v44  ;;  %v303_v54 = vadd.f32 %v295_v47, %v279_v46  ;;  %v311_v55 = vmul.f32 %v279_v46, %v1116_v19  ;;  %v312_v57 = vmul.f32 %v280_v48, %v1118_v20 }
  0x4c   : > { %v304_v56 = vadd.f32 %v296_v49, %v280_v48  ;;  %v305_v58 = vadd.f32 %v297_v51, %v281_v50  ;;  %v313_v59 = vmul.f32 %v281_v50, %v1120_v21  ;;  %v318_v60 = vsub.f32 %v294_v45, %v310_v53 }
  0x4d   : > { %v334_v61 = vmul.f32 %v302_v52, %v1114_v18  ;;  %v319_v62 = vsub.f32 %v295_v47, %v311_v55  ;;  %v335_v63 = vmul.f32 %v303_v54, %v1116_v19  ;;  %v320_v0 = vsub.f32 %v296_v49, %v312_v57 }
  0x4e   : > { %v336_v1 = vmul.f32 %v304_v56, %v1118_v20  ;;  %v321_v2 = vsub.f32 %v297_v51, %v313_v59  ;;  %v337_v3 = vmul.f32 %v305_v58, %v1120_v21  ;;  %v326_v4 = vadd.f32 %v318_v60, %v302_v52 }
  0x4f   : > { %v342_v5 = vsub.f32 %v318_v60, %v334_v61  ;;  %v327_v6 = vadd.f32 %v319_v62, %v303_v54  ;;  %v343_v7 = vsub.f32 %v319_v62, %v335_v63  ;;  %v328_v8 = vadd.f32 %v320_v0, %v304_v56 }
  0x50   : > { %v344_v9 = vsub.f32 %v320_v0, %v336_v1  ;;  %v329_v10 = vadd.f32 %v321_v2, %v305_v58  ;;  %v345_v11 = vsub.f32 %v321_v2, %v337_v3  ;;  %v358_v13 = vmul.f32 %v326_v4, %v1114_v18 }
  0x51   : > { %v350_v12 = vadd.f32 %v342_v5, %v326_v4  ;;  %v351_v14 = vadd.f32 %v343_v7, %v327_v6  ;;  %v359_v16 = vmul.f32 %v327_v6, %v1116_v19  ;;  %v360_v27 = vmul.f32 %v328_v8, %v1118_v20 }
  0x52   : > { %v352_v17 = vadd.f32 %v344_v9, %v328_v8  ;;  %v353_v28 = vadd.f32 %v345_v11, %v329_v10  ;;  %v361_v29 = vmul.f32 %v329_v10, %v1120_v21  ;;  %v366_v30 = vsub.f32 %v342_v5, %v358_v13 }
  0x53   : > { %v382_v31 = vmul.f32 %v350_v12, %v1114_v18  ;;  %v367_v32 = vsub.f32 %v343_v7, %v359_v16  ;;  %v383_v33 = vmul.f32 %v351_v14, %v1116_v19  ;;  %v368_v34 = vsub.f32 %v344_v9, %v360_v27 }
  0x54   : > { %v384_v35 = vmul.f32 %v352_v17, %v1118_v20  ;;  %v369_v36 = vsub.f32 %v345_v11, %v361_v29  ;;  %v385_v37 = vmul.f32 %v353_v28, %v1120_v21  ;;  %v374_v38 = vadd.f32 %v366_v30, %v350_v12 }
  0x55   : > { %v390_v39 = vsub.f32 %v366_v30, %v382_v31  ;;  %v375_v40 = vadd.f32 %v367_v32, %v351_v14  ;;  %v391_v41 = vsub.f32 %v367_v32, %v383_v33  ;;  %v376_v42 = vadd.f32 %v368_v34, %v352_v17 }
  0x56   : > { %v392_v44 = vsub.f32 %v368_v34, %v384_v35  ;;  %v377_v45 = vadd.f32 %v369_v36, %v353_v28  ;;  %v393_v46 = vsub.f32 %v369_v36, %v385_v37  ;;  %v406_v48 = vmul.f32 %v374_v38, %v1114_v18 }
  0x57   : > { %v398_v47 = vadd.f32 %v390_v39, %v374_v38  ;;  %v399_v49 = vadd.f32 %v391_v41, %v375_v40  ;;  %v407_v50 = vmul.f32 %v375_v40, %v1116_v19  ;;  %v408_v52 = vmul.f32 %v376_v42, %v1118_v20 }
  0x58   : > { %v400_v51 = vadd.f32 %v392_v44, %v376_v42  ;;  %v401_v53 = vadd.f32 %v393_v46, %v377_v45  ;;  %v409_v54 = vmul.f32 %v377_v45, %v1120_v21  ;;  %v414_v55 = vsub.f32 %v390_v39, %v406_v48 }
  0x59   : > { %v430_v56 = vmul.f32 %v398_v47, %v1114_v18  ;;  %v415_v57 = vsub.f32 %v391_v41, %v407_v50  ;;  %v431_v58 = vmul.f32 %v399_v49, %v1116_v19  ;;  %v416_v59 = vsub.f32 %v392_v44, %v408_v52 }
  0x5a   : > { %v432_v60 = vmul.f32 %v400_v51, %v1118_v20  ;;  %v417_v61 = vsub.f32 %v393_v46, %v409_v54  ;;  %v433_v62 = vmul.f32 %v401_v53, %v1120_v21  ;;  %v422_v63 = vadd.f32 %v414_v55, %v398_v47 }
  0x5b   : > { %v438_v0 = vsub.f32 %v414_v55, %v430_v56  ;;  %v423_v1 = vadd.f32 %v415_v57, %v399_v49  ;;  %v439_v2 = vsub.f32 %v415_v57, %v431_v58  ;;  %v424_v3 = vadd.f32 %v416_v59, %v400_v51 }
  0x5c   : > { %v440_v4 = vsub.f32 %v416_v59, %v432_v60  ;;  %v425_v5 = vadd.f32 %v417_v61, %v401_v53  ;;  %v441_v6 = vsub.f32 %v417_v61, %v433_v62  ;;  %v454_v8 = vmul.f32 %v422_v63, %v1114_v18 }
  0x5d   : > { %v446_v7 = vadd.f32 %v438_v0, %v422_v63  ;;  %v447_v9 = vadd.f32 %v439_v2, %v423_v1  ;;  %v455_v10 = vmul.f32 %v423_v1, %v1116_v19  ;;  %v456_v12 = vmul.f32 %v424_v3, %v1118_v20 }
  0x5e   : > { %v448_v11 = vadd.f32 %v440_v4, %v424_v3  ;;  %v449_v13 = vadd.f32 %v441_v6, %v425_v5  ;;  %v457_v14 = vmul.f32 %v425_v5, %v1120_v21  ;;  %v462_v16 = vsub.f32 %v438_v0, %v454_v8 }
  0x5f   : > { %v478_v17 = vmul.f32 %v446_v7, %v1114_v18  ;;  %v463_v27 = vsub.f32 %v439_v2, %v455_v10  ;;  %v479_v28 = vmul.f32 %v447_v9, %v1116_v19  ;;  %v464_v29 = vsub.f32 %v440_v4, %v456_v12 }
  0x60   : > { %v480_v30 = vmul.f32 %v448_v11, %v1118_v20  ;;  %v465_v31 = vsub.f32 %v441_v6, %v457_v14  ;;  %v481_v32 = vmul.f32 %v449_v13, %v1120_v21  ;;  %v470_v33 = vadd.f32 %v462_v16, %v446_v7 }
  0x61   : > { %v486_v34 = vsub.f32 %v462_v16, %v478_v17  ;;  %v471_v35 = vadd.f32 %v463_v27, %v447_v9  ;;  %v487_v36 = vsub.f32 %v463_v27, %v479_v28  ;;  %v472_v37 = vadd.f32 %v464_v29, %v448_v11 }
  0x62   : > { %v488_v38 = vsub.f32 %v464_v29, %v480_v30  ;;  %v473_v39 = vadd.f32 %v465_v31, %v449_v13  ;;  %v489_v40 = vsub.f32 %v465_v31, %v481_v32  ;;  %v502_v42 = vmul.f32 %v470_v33, %v1114_v18 }
  0x63   : > { %v494_v41 = vadd.f32 %v486_v34, %v470_v33  ;;  %v495_v44 = vadd.f32 %v487_v36, %v471_v35  ;;  %v503_v45 = vmul.f32 %v471_v35, %v1116_v19  ;;  %v504_v47 = vmul.f32 %v472_v37, %v1118_v20 }
  0x64   : > { %v496_v46 = vadd.f32 %v488_v38, %v472_v37  ;;  %v497_v48 = vadd.f32 %v489_v40, %v473_v39  ;;  %v505_v49 = vmul.f32 %v473_v39, %v1120_v21  ;;  %v510_v50 = vsub.f32 %v486_v34, %v502_v42 }
  0x65   : > { %v526_v51 = vmul.f32 %v494_v41, %v1114_v18  ;;  %v511_v52 = vsub.f32 %v487_v36, %v503_v45  ;;  %v527_v53 = vmul.f32 %v495_v44, %v1116_v19  ;;  %v512_v54 = vsub.f32 %v488_v38, %v504_v47 }
  0x66   : > { %v528_v55 = vmul.f32 %v496_v46, %v1118_v20  ;;  %v513_v56 = vsub.f32 %v489_v40, %v505_v49  ;;  %v529_v57 = vmul.f32 %v497_v48, %v1120_v21  ;;  %v518_v58 = vadd.f32 %v510_v50, %v494_v41 }
  0x67   : > { %v534_v59 = vsub.f32 %v510_v50, %v526_v51  ;;  %v519_v60 = vadd.f32 %v511_v52, %v495_v44  ;;  %v535_v61 = vsub.f32 %v511_v52, %v527_v53  ;;  %v520_v62 = vadd.f32 %v512_v54, %v496_v46 }
  0x68   : > { %v536_v63 = vsub.f32 %v512_v54, %v528_v55  ;;  %v521_v0 = vadd.f32 %v513_v56, %v497_v48  ;;  %v537_v1 = vsub.f32 %v513_v56, %v529_v57  ;;  %v550_v3 = vmul.f32 %v518_v58, %v1114_v18 }
  0x69   : > { %v542_v2 = vadd.f32 %v534_v59, %v518_v58  ;;  %v543_v4 = vadd.f32 %v535_v61, %v519_v60  ;;  %v551_v5 = vmul.f32 %v519_v60, %v1116_v19  ;;  %v552_v7 = vmul.f32 %v520_v62, %v1118_v20 }
  0x6a   : > { %v544_v6 = vadd.f32 %v536_v63, %v520_v62  ;;  %v545_v8 = vadd.f32 %v537_v1, %v521_v0  ;;  %v553_v9 = vmul.f32 %v521_v0, %v1120_v21  ;;  %v558_v10 = vsub.f32 %v534_v59, %v550_v3 }
  0x6b   : > { %v574_v11 = vmul.f32 %v542_v2, %v1114_v18  ;;  %v559_v12 = vsub.f32 %v535_v61, %v551_v5  ;;  %v575_v13 = vmul.f32 %v543_v4, %v1116_v19  ;;  %v560_v14 = vsub.f32 %v536_v63, %v552_v7 }
  0x6c   : > { %v576_v16 = vmul.f32 %v544_v6, %v1118_v20  ;;  %v561_v17 = vsub.f32 %v537_v1, %v553_v9  ;;  %v577_v27 = vmul.f32 %v545_v8, %v1120_v21  ;;  %v566_v28 = vadd.f32 %v558_v10, %v542_v2 }
  0x6d   : > { %v582_v29 = vsub.f32 %v558_v10, %v574_v11  ;;  %v567_v30 = vadd.f32 %v559_v12, %v543_v4  ;;  %v583_v31 = vsub.f32 %v559_v12, %v575_v13  ;;  %v568_v32 = vadd.f32 %v560_v14, %v544_v6 }
  0x6e   : > { %v584_v33 = vsub.f32 %v560_v14, %v576_v16  ;;  %v569_v34 = vadd.f32 %v561_v17, %v545_v8  ;;  %v585_v35 = vsub.f32 %v561_v17, %v577_v27  ;;  %v598_v37 = vmul.f32 %v566_v28, %v1114_v18 }
  0x6f   : > { %v590_v36 = vadd.f32 %v582_v29, %v566_v28  ;;  %v591_v38 = vadd.f32 %v583_v31, %v567_v30  ;;  %v599_v39 = vmul.f32 %v567_v30, %v1116_v19  ;;  %v600_v41 = vmul.f32 %v568_v32, %v1118_v20 }
  0x70   : > { %v592_v40 = vadd.f32 %v584_v33, %v568_v32  ;;  %v593_v42 = vadd.f32 %v585_v35, %v569_v34  ;;  %v601_v44 = vmul.f32 %v569_v34, %v1120_v21  ;;  %v606_v45 = vsub.f32 %v582_v29, %v598_v37 }
  0x71   : > { %v622_v46 = vmul.f32 %v590_v36, %v1114_v18  ;;  %v607_v47 = vsub.f32 %v583_v31, %v599_v39  ;;  %v623_v48 = vmul.f32 %v591_v38, %v1116_v19  ;;  %v608_v49 = vsub.f32 %v584_v33, %v600_v41 }
  0x72   : > { %v624_v50 = vmul.f32 %v592_v40, %v1118_v20  ;;  %v609_v51 = vsub.f32 %v585_v35, %v601_v44  ;;  %v625_v52 = vmul.f32 %v593_v42, %v1120_v21  ;;  %v614_v53 = vadd.f32 %v606_v45, %v590_v36 }
  0x73   : > { %v630_v54 = vsub.f32 %v606_v45, %v622_v46  ;;  %v615_v55 = vadd.f32 %v607_v47, %v591_v38  ;;  %v631_v56 = vsub.f32 %v607_v47, %v623_v48  ;;  %v616_v57 = vadd.f32 %v608_v49, %v592_v40 }
  0x74   : > { %v632_v58 = vsub.f32 %v608_v49, %v624_v50  ;;  %v617_v59 = vadd.f32 %v609_v51, %v593_v42  ;;  %v633_v60 = vsub.f32 %v609_v51, %v625_v52  ;;  %v646_v62 = vmul.f32 %v614_v53, %v1114_v18 }
  0x75   : > { %v638_v61 = vadd.f32 %v630_v54, %v614_v53  ;;  %v639_v63 = vadd.f32 %v631_v56, %v615_v55  ;;  %v647_v0 = vmul.f32 %v615_v55, %v1116_v19  ;;  %v648_v2 = vmul.f32 %v616_v57, %v1118_v20 }
  0x76   : > { %v640_v1 = vadd.f32 %v632_v58, %v616_v57  ;;  %v641_v3 = vadd.f32 %v633_v60, %v617_v59  ;;  %v649_v4 = vmul.f32 %v617_v59, %v1120_v21  ;;  %v654_v5 = vsub.f32 %v630_v54, %v646_v62 }
  0x77   : > { %v670_v6 = vmul.f32 %v638_v61, %v1114_v18  ;;  %v655_v7 = vsub.f32 %v631_v56, %v647_v0  ;;  %v671_v8 = vmul.f32 %v639_v63, %v1116_v19  ;;  %v656_v9 = vsub.f32 %v632_v58, %v648_v2 }
  0x78   : > { %v672_v10 = vmul.f32 %v640_v1, %v1118_v20  ;;  %v657_v11 = vsub.f32 %v633_v60, %v649_v4  ;;  %v673_v12 = vmul.f32 %v641_v3, %v1120_v21  ;;  %v662_v13 = vadd.f32 %v654_v5, %v638_v61 }
  0x79   : > { %v678_v14 = vsub.f32 %v654_v5, %v670_v6  ;;  %v663_v16 = vadd.f32 %v655_v7, %v639_v63  ;;  %v679_v17 = vsub.f32 %v655_v7, %v671_v8  ;;  %v664_v27 = vadd.f32 %v656_v9, %v640_v1 }
  0x7a   : > { %v680_v28 = vsub.f32 %v656_v9, %v672_v10  ;;  %v665_v29 = vadd.f32 %v657_v11, %v641_v3  ;;  %v681_v30 = vsub.f32 %v657_v11, %v673_v12  ;;  %v266_v19 = vmul.f32 %v1112_v15, %v1122_v22 }
  0x7b   : > { %v686_v31 = vadd.f32 %v678_v14, %v662_v13  ;;  %v687_v18 = vadd.f32 %v679_v17, %v663_v16  ;;  %v290_v20 = vmul.f32 %v1158_v43, %v1122_v22  ;;  %v259_v21 = vadd.f32 %v1112_v15, %v1126_v24 }
  0x7c   : > { %v688_v32 = vadd.f32 %v680_v28, %v664_v27  ;;  %v689_v33 = vadd.f32 %v681_v30, %v665_v29  ;;  %v267_v34 = vmul.f32 %v1112_v15, %v1126_v24  ;;  %v274_v37 = vsub.f32 %v1122_v22, %v266_v19 }
  0x7d   : > { %v695_v35 = vmul.f32 %v1124_v23, %v686_v31  ;;  %v696_v36 = vmul.f32 %v1124_v23, %v687_v18  ;;  %v260_v38 = vadd.f32 %v1112_v15, %v1128_v25  ;;  %v291_v42 = vmul.f32 %v259_v21, %v1126_v24 }
  0x7e   : > { %v697_v39 = vmul.f32 %v1124_v23, %v688_v32  ;;  %v698_v40 = vmul.f32 %v1124_v23, %v689_v33  ;;  %v275_v41 = vsub.f32 %v1126_v24, %v267_v34  ;;  %v282_v44 = vadd.f32 %v274_v37, %v1158_v43 }
  0x7f   : > { %705 = vst [vmem:[%s1243_s29] sm:$0xff] %v695_v35  ;;  %706 = vst [vmem:[%s1243_s29 + $0x8] sm:$0xff] %v696_v36  ;;  %v298_v45 = vsub.f32 %v274_v37, %v290_v20  ;;  %v268_v46 = vmul.f32 %v1112_v15, %v1128_v25  ;;  %v292_v47 = vmul.f32 %v260_v38, %v1128_v25 }
  0x80   : > { %707 = vst [vmem:[%s1243_s29 + $0x10] sm:$0xff] %v697_v39  ;;  %708 = vst [vmem:[%s1243_s29 + $0x18] sm:$0xff] %v698_v40  ;;  %v283_v48 = vadd.f32 %v275_v41, %v259_v21  ;;  %v299_v49 = vsub.f32 %v275_v41, %v291_v42  ;;  %v261_v50 = vadd.f32 %v1112_v15, %v1130_v26 }
  0x81   : > { %v269_v51 = vmul.f32 %v1112_v15, %v1130_v26  ;;  %v306_v52 = vadd.f32 %v298_v45, %v282_v44  ;;  %v314_v53 = vmul.f32 %v282_v44, %v1122_v22  ;;  %v276_v43 = vsub.f32 %v1128_v25, %v268_v46 }
  0x82   : > { %v307_v54 = vadd.f32 %v299_v49, %v283_v48  ;;  %v315_v55 = vmul.f32 %v283_v48, %v1126_v24  ;;  %v293_v57 = vmul.f32 %v261_v50, %v1130_v26 }
  0x83   : > { %v277_v56 = vsub.f32 %v1130_v26, %v269_v51  ;;  %v322_v58 = vsub.f32 %v298_v45, %v314_v53  ;;  %v338_v59 = vmul.f32 %v306_v52, %v1122_v22  ;;  %v284_v60 = vadd.f32 %v276_v43, %v260_v38 }
  0x84   : > { %v300_v61 = vsub.f32 %v276_v43, %v292_v47  ;;  %v323_v62 = vsub.f32 %v299_v49, %v315_v55  ;;  %v339_v15 = vmul.f32 %v307_v54, %v1126_v24 }
  0x85   : > { %v285_v63 = vadd.f32 %v277_v56, %v261_v50  ;;  %v301_v0 = vsub.f32 %v277_v56, %v293_v57  ;;  %v330_v1 = vadd.f32 %v322_v58, %v306_v52  ;;  %v346_v2 = vsub.f32 %v322_v58, %v338_v59 }
  0x86   : > { %v308_v3 = vadd.f32 %v300_v61, %v284_v60  ;;  %v316_v4 = vmul.f32 %v284_v60, %v1128_v25  ;;  %v331_v5 = vadd.f32 %v323_v62, %v307_v54  ;;  %v347_v6 = vsub.f32 %v323_v62, %v339_v15 }
  0x87   : > { %v309_v7 = vadd.f32 %v301_v0, %v285_v63  ;;  %v317_v8 = vmul.f32 %v285_v63, %v1130_v26  ;;  %v354_v9 = vadd.f32 %v346_v2, %v330_v1  ;;  %v362_v10 = vmul.f32 %v330_v1, %v1122_v22 }
  0x88   : > { %v324_v11 = vsub.f32 %v300_v61, %v316_v4  ;;  %v340_v12 = vmul.f32 %v308_v3, %v1128_v25  ;;  %v355_v13 = vadd.f32 %v347_v6, %v331_v5  ;;  %v363_v14 = vmul.f32 %v331_v5, %v1126_v24 }
  0x89   : > { %v325_v16 = vsub.f32 %v301_v0, %v317_v8  ;;  %v341_v17 = vmul.f32 %v309_v7, %v1130_v26  ;;  %v370_v27 = vsub.f32 %v346_v2, %v362_v10  ;;  %v386_v28 = vmul.f32 %v354_v9, %v1122_v22 }
  0x8a   : > { %v332_v29 = vadd.f32 %v324_v11, %v308_v3  ;;  %v348_v30 = vsub.f32 %v324_v11, %v340_v12  ;;  %v371_v31 = vsub.f32 %v347_v6, %v363_v14  ;;  %v387_v18 = vmul.f32 %v355_v13, %v1126_v24 }
  0x8b   : > { %v333_v19 = vadd.f32 %v325_v16, %v309_v7  ;;  %v349_v20 = vsub.f32 %v325_v16, %v341_v17  ;;  %v378_v32 = vadd.f32 %v370_v27, %v354_v9  ;;  %v394_v33 = vsub.f32 %v370_v27, %v386_v28 }
  0x8c   : > { %v356_v21 = vadd.f32 %v348_v30, %v332_v29  ;;  %v364_v34 = vmul.f32 %v332_v29, %v1128_v25  ;;  %v379_v35 = vadd.f32 %v371_v31, %v355_v13  ;;  %v395_v36 = vsub.f32 %v371_v31, %v387_v18 }
  0x8d   : > { %v357_v37 = vadd.f32 %v349_v20, %v333_v19  ;;  %v365_v38 = vmul.f32 %v333_v19, %v1130_v26  ;;  %v402_v39 = vadd.f32 %v394_v33, %v378_v32  ;;  %v410_v40 = vmul.f32 %v378_v32, %v1122_v22 }
  0x8e   : > { %v372_v41 = vsub.f32 %v348_v30, %v364_v34  ;;  %v388_v42 = vmul.f32 %v356_v21, %v1128_v25  ;;  %v403_v44 = vadd.f32 %v395_v36, %v379_v35  ;;  %v411_v45 = vmul.f32 %v379_v35, %v1126_v24 }
  0x8f   : > { %v373_v46 = vsub.f32 %v349_v20, %v365_v38  ;;  %v389_v47 = vmul.f32 %v357_v37, %v1130_v26  ;;  %v418_v48 = vsub.f32 %v394_v33, %v410_v40  ;;  %v434_v49 = vmul.f32 %v402_v39, %v1122_v22 }
  0x90   : > { %v380_v50 = vadd.f32 %v372_v41, %v356_v21  ;;  %v396_v51 = vsub.f32 %v372_v41, %v388_v42  ;;  %v419_v52 = vsub.f32 %v395_v36, %v411_v45  ;;  %v435_v53 = vmul.f32 %v403_v44, %v1126_v24 }
  0x91   : > { %v381_v43 = vadd.f32 %v373_v46, %v357_v37  ;;  %v397_v54 = vsub.f32 %v373_v46, %v389_v47  ;;  %v426_v55 = vadd.f32 %v418_v48, %v402_v39  ;;  %v442_v56 = vsub.f32 %v418_v48, %v434_v49 }
  0x92   : > { %v404_v57 = vadd.f32 %v396_v51, %v380_v50  ;;  %v412_v58 = vmul.f32 %v380_v50, %v1128_v25  ;;  %v427_v59 = vadd.f32 %v419_v52, %v403_v44  ;;  %v443_v60 = vsub.f32 %v419_v52, %v435_v53 }
  0x93   : > { %v405_v61 = vadd.f32 %v397_v54, %v381_v43  ;;  %v413_v62 = vmul.f32 %v381_v43, %v1130_v26  ;;  %v450_v15 = vadd.f32 %v442_v56, %v426_v55  ;;  %v458_v63 = vmul.f32 %v426_v55, %v1122_v22 }
  0x94   : > { %v420_v0 = vsub.f32 %v396_v51, %v412_v58  ;;  %v436_v1 = vmul.f32 %v404_v57, %v1128_v25  ;;  %v451_v2 = vadd.f32 %v443_v60, %v427_v59  ;;  %v459_v3 = vmul.f32 %v427_v59, %v1126_v24 }
  0x95   : > { %v421_v4 = vsub.f32 %v397_v54, %v413_v62  ;;  %v437_v5 = vmul.f32 %v405_v61, %v1130_v26  ;;  %v466_v6 = vsub.f32 %v442_v56, %v458_v63  ;;  %v482_v7 = vmul.f32 %v450_v15, %v1122_v22 }
  0x96   : > { %v428_v8 = vadd.f32 %v420_v0, %v404_v57  ;;  %v444_v9 = vsub.f32 %v420_v0, %v436_v1  ;;  %v467_v10 = vsub.f32 %v443_v60, %v459_v3  ;;  %v483_v11 = vmul.f32 %v451_v2, %v1126_v24 }
  0x97   : > { %v429_v12 = vadd.f32 %v421_v4, %v405_v61  ;;  %v445_v13 = vsub.f32 %v421_v4, %v437_v5  ;;  %v474_v14 = vadd.f32 %v466_v6, %v450_v15  ;;  %v490_v16 = vsub.f32 %v466_v6, %v482_v7 }
  0x98   : > { %v452_v17 = vadd.f32 %v444_v9, %v428_v8  ;;  %v460_v27 = vmul.f32 %v428_v8, %v1128_v25  ;;  %v475_v28 = vadd.f32 %v467_v10, %v451_v2  ;;  %v491_v29 = vsub.f32 %v467_v10, %v483_v11 }
  0x99   : > { %v453_v30 = vadd.f32 %v445_v13, %v429_v12  ;;  %v461_v31 = vmul.f32 %v429_v12, %v1130_v26  ;;  %v498_v18 = vadd.f32 %v490_v16, %v474_v14  ;;  %v506_v19 = vmul.f32 %v474_v14, %v1122_v22 }
  0x9a   : > { %v468_v20 = vsub.f32 %v444_v9, %v460_v27  ;;  %v484_v32 = vmul.f32 %v452_v17, %v1128_v25  ;;  %v499_v33 = vadd.f32 %v491_v29, %v475_v28  ;;  %v507_v21 = vmul.f32 %v475_v28, %v1126_v24 }
  0x9b   : > { %v469_v34 = vsub.f32 %v445_v13, %v461_v31  ;;  %v485_v35 = vmul.f32 %v453_v30, %v1130_v26  ;;  %v514_v36 = vsub.f32 %v490_v16, %v506_v19  ;;  %v530_v37 = vmul.f32 %v498_v18, %v1122_v22 }
  0x9c   : > { %v476_v38 = vadd.f32 %v468_v20, %v452_v17  ;;  %v492_v39 = vsub.f32 %v468_v20, %v484_v32  ;;  %v515_v40 = vsub.f32 %v491_v29, %v507_v21  ;;  %v531_v41 = vmul.f32 %v499_v33, %v1126_v24 }
  0x9d   : > { %v477_v42 = vadd.f32 %v469_v34, %v453_v30  ;;  %v493_v44 = vsub.f32 %v469_v34, %v485_v35  ;;  %v522_v45 = vadd.f32 %v514_v36, %v498_v18  ;;  %v538_v46 = vsub.f32 %v514_v36, %v530_v37 }
  0x9e   : > { %v500_v47 = vadd.f32 %v492_v39, %v476_v38  ;;  %v508_v48 = vmul.f32 %v476_v38, %v1128_v25  ;;  %v523_v49 = vadd.f32 %v515_v40, %v499_v33  ;;  %v539_v50 = vsub.f32 %v515_v40, %v531_v41 }
  0x9f   : > { %v501_v51 = vadd.f32 %v493_v44, %v477_v42  ;;  %v509_v52 = vmul.f32 %v477_v42, %v1130_v26  ;;  %v546_v53 = vadd.f32 %v538_v46, %v522_v45  ;;  %v554_v43 = vmul.f32 %v522_v45, %v1122_v22 }
  0xa0   : > { %v516_v54 = vsub.f32 %v492_v39, %v508_v48  ;;  %v532_v55 = vmul.f32 %v500_v47, %v1128_v25  ;;  %v547_v56 = vadd.f32 %v539_v50, %v523_v49  ;;  %v555_v57 = vmul.f32 %v523_v49, %v1126_v24 }
  0xa1   : > { %v517_v58 = vsub.f32 %v493_v44, %v509_v52  ;;  %v533_v59 = vmul.f32 %v501_v51, %v1130_v26  ;;  %v562_v60 = vsub.f32 %v538_v46, %v554_v43  ;;  %v578_v61 = vmul.f32 %v546_v53, %v1122_v22 }
  0xa2   : > { %v524_v62 = vadd.f32 %v516_v54, %v500_v47  ;;  %v540_v15 = vsub.f32 %v516_v54, %v532_v55  ;;  %v563_v63 = vsub.f32 %v539_v50, %v555_v57  ;;  %v579_v0 = vmul.f32 %v547_v56, %v1126_v24 }
  0xa3   : > { %v525_v1 = vadd.f32 %v517_v58, %v501_v51  ;;  %v541_v2 = vsub.f32 %v517_v58, %v533_v59  ;;  %v570_v3 = vadd.f32 %v562_v60, %v546_v53  ;;  %v586_v4 = vsub.f32 %v562_v60, %v578_v61 }
  0xa4   : > { %v548_v5 = vadd.f32 %v540_v15, %v524_v62  ;;  %v556_v6 = vmul.f32 %v524_v62, %v1128_v25  ;;  %v571_v7 = vadd.f32 %v563_v63, %v547_v56  ;;  %v587_v8 = vsub.f32 %v563_v63, %v579_v0 }
  0xa5   : > { %v549_v9 = vadd.f32 %v541_v2, %v525_v1  ;;  %v557_v10 = vmul.f32 %v525_v1, %v1130_v26  ;;  %v594_v11 = vadd.f32 %v586_v4, %v570_v3  ;;  %v602_v12 = vmul.f32 %v570_v3, %v1122_v22 }
  0xa6   : > { %v564_v13 = vsub.f32 %v540_v15, %v556_v6  ;;  %v580_v14 = vmul.f32 %v548_v5, %v1128_v25  ;;  %v595_v16 = vadd.f32 %v587_v8, %v571_v7  ;;  %v603_v17 = vmul.f32 %v571_v7, %v1126_v24 }
  0xa7   : > { %v565_v27 = vsub.f32 %v541_v2, %v557_v10  ;;  %v581_v28 = vmul.f32 %v549_v9, %v1130_v26  ;;  %v610_v29 = vsub.f32 %v586_v4, %v602_v12  ;;  %v626_v30 = vmul.f32 %v594_v11, %v1122_v22 }
  0xa8   : > { %v572_v31 = vadd.f32 %v564_v13, %v548_v5  ;;  %v588_v18 = vsub.f32 %v564_v13, %v580_v14  ;;  %v611_v19 = vsub.f32 %v587_v8, %v603_v17  ;;  %v627_v20 = vmul.f32 %v595_v16, %v1126_v24 }
  0xa9   : > { %v573_v32 = vadd.f32 %v565_v27, %v549_v9  ;;  %v589_v33 = vsub.f32 %v565_v27, %v581_v28  ;;  %v618_v21 = vadd.f32 %v610_v29, %v594_v11  ;;  %v634_v34 = vsub.f32 %v610_v29, %v626_v30 }
  0xaa   : > { %v596_v35 = vadd.f32 %v588_v18, %v572_v31  ;;  %v604_v36 = vmul.f32 %v572_v31, %v1128_v25  ;;  %v619_v37 = vadd.f32 %v611_v19, %v595_v16  ;;  %v635_v38 = vsub.f32 %v611_v19, %v627_v20 }
  0xab   : > { %v597_v39 = vadd.f32 %v589_v33, %v573_v32  ;;  %v605_v40 = vmul.f32 %v573_v32, %v1130_v26  ;;  %v642_v41 = vadd.f32 %v634_v34, %v618_v21  ;;  %v650_v42 = vmul.f32 %v618_v21, %v1122_v22 }
  0xac   : > { %v612_v44 = vsub.f32 %v588_v18, %v604_v36  ;;  %v628_v45 = vmul.f32 %v596_v35, %v1128_v25  ;;  %v643_v46 = vadd.f32 %v635_v38, %v619_v37  ;;  %v651_v47 = vmul.f32 %v619_v37, %v1126_v24 }
  0xad   : > { %v613_v48 = vsub.f32 %v589_v33, %v605_v40  ;;  %v629_v49 = vmul.f32 %v597_v39, %v1130_v26  ;;  %v658_v50 = vsub.f32 %v634_v34, %v650_v42  ;;  %v674_v51 = vmul.f32 %v642_v41, %v1122_v22 }
  0xae   : > { %v620_v52 = vadd.f32 %v612_v44, %v596_v35  ;;  %v636_v53 = vsub.f32 %v612_v44, %v628_v45  ;;  %v659_v43 = vsub.f32 %v635_v38, %v651_v47  ;;  %v675_v54 = vmul.f32 %v643_v46, %v1126_v24 }
  0xaf   : > { %v621_v55 = vadd.f32 %v613_v48, %v597_v39  ;;  %v637_v56 = vsub.f32 %v613_v48, %v629_v49  ;;  %v666_v57 = vadd.f32 %v658_v50, %v642_v41  ;;  %v682_v58 = vsub.f32 %v658_v50, %v674_v51 }
  0xb0   : > { %v644_v59 = vadd.f32 %v636_v53, %v620_v52  ;;  %v652_v60 = vmul.f32 %v620_v52, %v1128_v25  ;;  %v667_v61 = vadd.f32 %v659_v43, %v643_v46  ;;  %v683_v62 = vsub.f32 %v659_v43, %v675_v54 }
  0xb1   : > { %v645_v15 = vadd.f32 %v637_v56, %v621_v55  ;;  %v653_v63 = vmul.f32 %v621_v55, %v1130_v26  ;;  %v690_v22 = vadd.f32 %v682_v58, %v666_v57 }
  0xb2   : > { %v660_v0 = vsub.f32 %v636_v53, %v652_v60  ;;  %v676_v24 = vmul.f32 %v644_v59, %v1128_v25  ;;  %v691_v1 = vadd.f32 %v683_v62, %v667_v61 }
  0xb3   : > { %v661_v2 = vsub.f32 %v637_v56, %v653_v63  ;;  %v677_v3 = vmul.f32 %v645_v15, %v1130_v26  ;;  %v699_v4 = vmul.f32 %v1124_v23, %v690_v22 }
  0xb4   : > { %v668_v5 = vadd.f32 %v660_v0, %v644_v59  ;;  %v684_v6 = vsub.f32 %v660_v0, %v676_v24  ;;  %v700_v7 = vmul.f32 %v1124_v23, %v691_v1 }
  0xb5   : > { %v669_v8 = vadd.f32 %v661_v2, %v645_v15  ;;  %v685_v9 = vsub.f32 %v661_v2, %v677_v3  ;;  %709 = vst [vmem:[%s1243_s29 + $0x20] sm:$0xff] %v699_v4 }
  0xb6   : > { %v692_v10 = vadd.f32 %v684_v6, %v668_v5  ;;  %710 = vst [vmem:[%s1243_s29 + $0x28] sm:$0xff] %v700_v7 }
  0xb7   : > { %v693_v25 = vadd.f32 %v685_v9, %v669_v8 }
  0xb8   : > { %v701_v26 = vmul.f32 %v1124_v23, %v692_v10 }
  0xb9   : > { %v702_v11 = vmul.f32 %v1124_v23, %v693_v25 }
  0xba   : > { %711 = vst [vmem:[%s1243_s29 + $0x30] sm:$0xff] %v701_v26 }
  0xbb   : > { %712 = vst [vmem:[%s1243_s29 + $0x38] sm:$0xff] %v702_v11 }
  0xbc   : > { %912 = shalt.err (!%p909_p10)
}
  0xbd   : > { %s913_s6 = scalar_lea.hbm %s1337_s20, 1024  ;;  %s917_s10 = scalar_lea.hbm %s1386_s4, 2048 }
  0xbe   : > { %p914_p0 = scmp.ne.s32.totalorder %s1337_s20, %s913_s6  ;;  %p918_p1 = scmp.lt.s32.totalorder %s1337_s20, %s1386_s4 }
  0xbf   : > { %p919_p3 = scmp.lt.s32.totalorder %s917_s10, %s913_s6 }
  0xc0   : > { %p915_p2 = pnand %p914_p0, %p1395_p12 }
  0xc1   : > { %p920_p6 = por %p919_p3, %p918_p1 }
  0xc2   : > { %p916_p9 = pneg %p915_p2 }
  0xc4   : > { %p921_p11 = pnand %p920_p6, %p916_p9 }
  0xc6   : > { %924 = shalt.err (!%p921_p11)
}
  0xc7   : > { %s969_s11 = smov 512   ;;  %s970_s13 = smov 32  }
  0xc8   : > { %823 = dma.vmem_to_hbm [thread:$0]  (%p1395_p12), %s1329_s15, 1024, %s1337_s20, %s714_s1, %s969_s11, %s969_s11, %s970_s13  }
  0xc9 PF: > { %s743_s14 = sand.u32 1, %s951_s21   ;;  %p1396_p13 = scmp.ne.s32.totalorder %s1392_s5, 0 }
  0xca   : > { %p1397_p4 = scmp.ge.s32.totalorder %s963_s24, 2  ;;  %s744_s29 = scalar_lea.sflag [#allocation7], %s743_s14 }
  0xcc   : > { %p830_p5 = pnand %p1397_p4, %p1396_p13 }
  0xce   : > { %p831_p7 = pneg %p830_p5 }
  0xd0   : > { %946 = dma.done.wait (%p831_p7), %s744_s29, 1024  }
  0xd1   : > { %948 = vsyncadd (%p831_p7), %s744_s29, 4294966272  ;;  %p20_p8 = scmp.ge.s32.totalorder %s1030_s2, 4   ;;  %s1398_s21 = smov %s955_s22 }
  0xd2   : > { %s1399_s22 = smov %s959_s23  ;;  %s1400_s23 = smov %s1042_s27 }
  0xd3   : > { %s1401_s24 = smov %s1030_s2  ;;  %22 = sbr.rel (!%p20_p8) target bundleno = 9 (0x9), region = 83 }
  0xd8   :  { %749 = vsyncpa [#allocation6], 1 }
  0xd9   :  { %751 = vsyncpa [#allocation6 + $0x1], 1 }
  0xda   :  { %752 = vsyncpa [#allocation7], 1 }
  0xdb   :  { %754 = vsyncpa [#allocation7 + $0x1], 1 }

</bundles_post_ra>
